<compile_context>
chip_gen: v6e
topology: v6e:2x2x1
jax: 0.10.0
libtpu: 0.0.40
codegen_flags: <defaults>
</compile_context>

<pallas_src>
import jax
import jax.numpy as jnp
from jax.experimental import pallas as pl
from jax.experimental.pallas import tpu as pltpu

_LANE = 128


def _shared_ctx_kernel(v_ref, h1_ref, h2_ref, h3_ref, h4_ref, b_ref, o_ref):
    """Fast path: context shared by all rows, W pre-folded into v = c @ W^T.

    v_ref: (1, dim); h*_ref: (TR, dim); b_ref: (1,) scalar bias in SMEM;
    o_ref: (4, TR) lane-dense scores, row order [h2, h1, h4, h3].
    """
    v = v_ref[...]                                               # (1, dim)
    b = b_ref[0]

    def score(h):                                                # (1, TR) skinny MXU matmul
        return jax.lax.dot_general(
            v, h, dimension_numbers=(((1,), (1,)), ((), ())),
            preferred_element_type=jnp.float32)

    s = jnp.concatenate(
        [score(h2_ref[...]), score(h1_ref[...]),
         score(h4_ref[...]), score(h3_ref[...])], axis=0)        # (4, TR)
    o_ref[...] = (s + b).astype(o_ref.dtype)                     # single unmasked store


def _rowwise_ctx_kernel(c_ref, w_ref, h1_ref, h2_ref, h3_ref, h4_ref, b_ref, o_ref):
    """Fallback: per-row context c of shape (TR, dim).

    Folds W onto the context once per tile (1 MXU matmul instead of 4); each
    group's scores come from an elementwise product + ones-vector contraction,
    producing a lane-dense (4, TR) output block.
    """
    u = jax.lax.dot_general(                                     # (TR, dim) = c @ W^T
        c_ref[...], w_ref[...],
        dimension_numbers=(((1,), (1,)), ((), ())),
        preferred_element_type=jnp.float32).astype(c_ref.dtype)
    b = b_ref[0]
    ones = jnp.ones((1, u.shape[1]), dtype=u.dtype)

    def score(h):                                                # (1, TR)
        return jax.lax.dot_general(
            ones, h * u, dimension_numbers=(((1,), (1,)), ((), ())),
            preferred_element_type=jnp.float32)

    s = jnp.concatenate(
        [score(h2_ref[...]), score(h1_ref[...]),
         score(h4_ref[...]), score(h3_ref[...])], axis=0)        # (4, TR)
    o_ref[...] = (s + b).astype(o_ref.dtype)


def _pick_row_tile(N, dim, itemsize, n_streams, vmem_budget_bytes):
    """Roofline/VMEM-aware row tile.

    Targets ~2 MiB of h traffic per grid step (amortizes the ~0.35 us/step
    pipeline overhead), accounts for lane padding (last dim pads to 128),
    clamps by a VMEM budget for the double-buffered h streams, and returns
    either the full N (single block) or a multiple of 128 (lane-dense output
    block constraint).
    """
    padded_dim = -(-dim // _LANE) * _LANE
    bytes_per_row = padded_dim * itemsize
    target_rows = max((2 * 1024 * 1024) // (n_streams * bytes_per_row), _LANE)
    vmem_rows = max(vmem_budget_bytes // (n_streams * 2 * bytes_per_row), _LANE)
    tr = min(target_rows, vmem_rows)
    if N <= tr:
        return N                       # single block: full-extent dims are always legal
    return (tr // _LANE) * _LANE       # tiled: output minor dim must be a multiple of 128


def discriminator1_forward(h1, h2, h3, h4, c, w, b, *,
                           vmem_budget_bytes=24 * 1024 * 1024):
    """Pallas implementation of Discriminator1.forward.

    h1..h4: (N, dim); c: (1, dim) / (dim,) shared context (module semantics) or
    (N, dim) per-row; w: (dim, dim) Bilinear weight W[0]; b: (1,) Bilinear bias.
    Returns (4*N,) ordered [fn(h2,c), fn(h1,c), fn(h4,c), fn(h3,c)].
    """
    h1 = jnp.asarray(h1)
    N, dim = h1.shape
    cdt = h1.dtype if jnp.issubdtype(h1.dtype, jnp.floating) else jnp.float32
    h1, h2, h3, h4 = (jnp.asarray(x, cdt) for x in (h1, h2, h3, h4))
    w = jnp.asarray(w, cdt).reshape(dim, dim)
    b = jnp.asarray(b, jnp.float32).reshape(1)
    c = jnp.asarray(c, cdt)
    if c.ndim == 1:
        c = c[None, :]
    shared_ctx = (c.shape[0] == 1)

    TR = _pick_row_tile(N, dim, jnp.dtype(cdt).itemsize, n_streams=4,
                        vmem_budget_bytes=vmem_budget_bytes)
    grid = (pl.cdiv(N, TR),)

    h_spec = pl.BlockSpec((TR, dim), lambda i: (i, 0))
    b_spec = pl.BlockSpec(memory_space=pltpu.MemorySpace.SMEM)   # scalar bias in SMEM
    out_spec = pl.BlockSpec((4, TR), lambda i: (0, i))           # lane-dense scores
    cparams = pltpu.CompilerParams(
        dimension_semantics=("parallel",),                       # v7x: split rows across TCs
        vmem_limit_bytes=48 * 1024 * 1024)                       # > v5e's 16 MiB scoped default

    if shared_ctx:
        # Fold the shared context into W once, outside the kernel: v = c @ W^T.
        # The kernel never touches W.
        v = jnp.matmul(c.astype(jnp.float32),
                       w.astype(jnp.float32).T).astype(cdt)      # (1, dim)
        v_spec = pl.BlockSpec((1, dim), lambda i: (0, 0))        # resident across row tiles
        out = pl.pallas_call(
            _shared_ctx_kernel,
            out_shape=jax.ShapeDtypeStruct((4, N), jnp.float32),
            grid=grid,
            in_specs=[v_spec, h_spec, h_spec, h_spec, h_spec, b_spec],
            out_specs=out_spec,
            compiler_params=cparams,
        )(v, h1, h2, h3, h4, b)
    else:
        c_spec = pl.BlockSpec((TR, dim), lambda i: (i, 0))       # per-row context tile
        w_spec = pl.BlockSpec((dim, dim), lambda i: (0, 0))      # resident W
        out = pl.pallas_call(
            _rowwise_ctx_kernel,
            out_shape=jax.ShapeDtypeStruct((4, N), jnp.float32),
            grid=grid,
            in_specs=[c_spec, w_spec, h_spec, h_spec, h_spec, h_spec, b_spec],
            out_specs=out_spec,
            compiler_params=cparams,
        )(c, w, h1, h2, h3, h4, b)

    # Rows are [h2, h1, h4, h3]; flattening gives the PyTorch concat order.
    return out.reshape(-1)


if __name__ == "__main__":
    key = jax.random.PRNGKey(0)
    dim = 32
    N = 8

    k1, k2, k3, k4, kc, kw, kb = jax.random.split(key, 7)
    h1 = jax.random.normal(k1, (N, dim), dtype=jnp.float32)
    h2 = jax.random.normal(k2, (N, dim), dtype=jnp.float32)
    h3 = jax.random.normal(k3, (N, dim), dtype=jnp.float32)
    h4 = jax.random.normal(k4, (N, dim), dtype=jnp.float32)
    c = jax.random.normal(kc, (1, dim), dtype=jnp.float32)

    # Deterministic Bilinear parameters (nn.Bilinear(dim, dim, 1): W (1,dim,dim), b (1,)).
    w = jax.random.normal(kw, (dim, dim), dtype=jnp.float32) * (1.0 / jnp.sqrt(dim))
    b = jax.random.normal(kb, (1,), dtype=jnp.float32) * 0.01

    # Pure-JAX reference (bilinear with out_features=1: sum((x @ W) * c, -1) + b).
    def ref_score(x, cx):
        return jnp.sum((x @ w) * cx, axis=-1) + b[0]

    # --- Fast path: shared context (1, dim), as produced by c.expand_as(h1). ---
    logits = discriminator1_forward(h1, h2, h3, h4, c, w, b)
    jax.block_until_ready(logits)

    c_x = jnp.broadcast_to(c, (N, dim))
    ref = jnp.concatenate([ref_score(h2, c_x), ref_score(h1, c_x),
                           ref_score(h4, c_x), ref_score(h3, c_x)])
    assert logits.shape == (4 * N,)
    assert jnp.allclose(logits, ref, atol=1e-4, rtol=1e-4)

    # --- Fallback path: per-row context (N, dim) — same semantics, other kernel. ---
    logits2 = discriminator1_forward(h1, h2, h3, h4, c_x, w, b)
    jax.block_until_ready(logits2)
    assert jnp.allclose(logits2, ref, atol=1e-4, rtol=1e-4)

    # --- Tiled path: N not a multiple of the row tile (exercises partial blocks). ---
    N2 = 1100
    g1, g2, g3, g4 = jax.random.split(jax.random.PRNGKey(1), 4)
    H1 = jax.random.normal(g1, (N2, dim), dtype=jnp.float32)
    H2 = jax.random.normal(g2, (N2, dim), dtype=jnp.float32)
    H3 = jax.random.normal(g3, (N2, dim), dtype=jnp.float32)
    H4 = jax.random.normal(g4, (N2, dim), dtype=jnp.float32)
    logits3 = discriminator1_forward(H1, H2, H3, H4, c, w, b)
    jax.block_until_ready(logits3)
    C2 = jnp.broadcast_to(c, (N2, dim))
    ref3 = jnp.concatenate([ref_score(H2, C2), ref_score(H1, C2),
                            ref_score(H4, C2), ref_score(H3, C2)])
    assert logits3.shape == (4 * N2,)
    assert jnp.allclose(logits3, ref3, atol=1e-4, rtol=1e-4)

    print("KERNEL_OK")
</pallas_src>

<mosaic_0001>
module attributes {stable_mosaic.version = 11 : i64} {
  func.func @_shared_ctx_kernel(%arg0: i32, %arg1: memref<1x32xf32, #tpu.memory_space<vmem>>, %arg2: memref<8x32xf32, #tpu.memory_space<vmem>>, %arg3: memref<8x32xf32, #tpu.memory_space<vmem>>, %arg4: memref<8x32xf32, #tpu.memory_space<vmem>>, %arg5: memref<8x32xf32, #tpu.memory_space<vmem>>, %arg6: memref<1xf32, #tpu.memory_space<smem>>, %arg7: memref<4x8xf32, #tpu.memory_space<vmem>>) attributes {dimension_semantics = [#tpu.dimension_semantics<parallel>], iteration_bounds = array<i64: 1>, scalar_prefetch = 0 : i64, scratch_operands = 0 : i64, tpu.core_type = #tpu.core_type<tc>, window_params = [{pipeline_mode = #tpu.pipeline_mode<synchronous>, transform_indices = @transform_0, window_bounds = array<i64: 1, 32>}, {transform_indices = @transform_1, window_bounds = array<i64: 8, 32>}, {transform_indices = @transform_2, window_bounds = array<i64: 8, 32>}, {transform_indices = @transform_3, window_bounds = array<i64: 8, 32>}, {transform_indices = @transform_4, window_bounds = array<i64: 8, 32>}, {transform_indices = @transform_5, window_bounds = array<i64: 1>}, {transform_indices = @transform_6, window_bounds = array<i64: 4, 8>}]} {
    %c0 = arith.constant 0 : index
    %c0_0 = arith.constant 0 : index
    %0 = vector.load %arg1[%c0, %c0_0] : memref<1x32xf32, #tpu.memory_space<vmem>>, vector<1x32xf32>
    %c0_1 = arith.constant 0 : index
    %1 = memref.load %arg6[%c0_1] : memref<1xf32, #tpu.memory_space<smem>>
    %c0_2 = arith.constant 0 : index
    %c0_3 = arith.constant 0 : index
    %2 = vector.load %arg3[%c0_2, %c0_3] : memref<8x32xf32, #tpu.memory_space<vmem>>, vector<8x32xf32>
    %cst = arith.constant dense<0.000000e+00> : vector<1x8xf32>
    %3 = tpu.matmul %0, %2, %cst {dimension_numbers = #tpu.dot_dimension_numbers<[1], [1], [0], [0], [0, 0, 1, 0], [], []>} : vector<1x32xf32>, vector<8x32xf32>, vector<1x8xf32> -> vector<1x8xf32>
    %c0_4 = arith.constant 0 : index
    %c0_5 = arith.constant 0 : index
    %4 = vector.load %arg2[%c0_4, %c0_5] : memref<8x32xf32, #tpu.memory_space<vmem>>, vector<8x32xf32>
    %cst_6 = arith.constant dense<0.000000e+00> : vector<1x8xf32>
    %5 = tpu.matmul %0, %4, %cst_6 {dimension_numbers = #tpu.dot_dimension_numbers<[1], [1], [0], [0], [0, 0, 1, 0], [], []>} : vector<1x32xf32>, vector<8x32xf32>, vector<1x8xf32> -> vector<1x8xf32>
    %c0_7 = arith.constant 0 : index
    %c0_8 = arith.constant 0 : index
    %6 = vector.load %arg5[%c0_7, %c0_8] : memref<8x32xf32, #tpu.memory_space<vmem>>, vector<8x32xf32>
    %cst_9 = arith.constant dense<0.000000e+00> : vector<1x8xf32>
    %7 = tpu.matmul %0, %6, %cst_9 {dimension_numbers = #tpu.dot_dimension_numbers<[1], [1], [0], [0], [0, 0, 1, 0], [], []>} : vector<1x32xf32>, vector<8x32xf32>, vector<1x8xf32> -> vector<1x8xf32>
    %c0_10 = arith.constant 0 : index
    %c0_11 = arith.constant 0 : index
    %8 = vector.load %arg4[%c0_10, %c0_11] : memref<8x32xf32, #tpu.memory_space<vmem>>, vector<8x32xf32>
    %cst_12 = arith.constant dense<0.000000e+00> : vector<1x8xf32>
    %9 = tpu.matmul %0, %8, %cst_12 {dimension_numbers = #tpu.dot_dimension_numbers<[1], [1], [0], [0], [0, 0, 1, 0], [], []>} : vector<1x32xf32>, vector<8x32xf32>, vector<1x8xf32> -> vector<1x8xf32>
    %10 = tpu.concatenate %3, %5, %7, %9 in 0 : vector<1x8xf32>, vector<1x8xf32>, vector<1x8xf32>, vector<1x8xf32> -> vector<4x8xf32>
    %11 = vector.broadcast %1 : f32 to vector<4x8xf32>
    %12 = arith.addf %10, %11 : vector<4x8xf32>
    %c0_13 = arith.constant 0 : index
    %c0_14 = arith.constant 0 : index
    %13 = vector.load %arg7[%c0_13, %c0_14] : memref<4x8xf32, #tpu.memory_space<vmem>>, vector<4x8xf32>
    tpu.vector_store %arg7[%c0_13, %c0_14], %12 {strides = array<i32>} : memref<4x8xf32, #tpu.memory_space<vmem>>, vector<4x8xf32>,
    return
  }
  func.func @transform_0(%arg0: i32) -> (i32, i32) {
    %c0_i32 = arith.constant 0 : i32
    %c0_i32_0 = arith.constant 0 : i32
    %c0_i32_1 = arith.constant 0 : i32
    return %c0_i32, %c0_i32_0 : i32, i32
  }
  func.func @transform_1(%arg0: i32) -> (i32, i32) {
    %c0_i32 = arith.constant 0 : i32
    %c0_i32_0 = arith.constant 0 : i32
    return %arg0, %c0_i32 : i32, i32
  }
  func.func @transform_2(%arg0: i32) -> (i32, i32) {
    %c0_i32 = arith.constant 0 : i32
    %c0_i32_0 = arith.constant 0 : i32
    return %arg0, %c0_i32 : i32, i32
  }
  func.func @transform_3(%arg0: i32) -> (i32, i32) {
    %c0_i32 = arith.constant 0 : i32
    %c0_i32_0 = arith.constant 0 : i32
    return %arg0, %c0_i32 : i32, i32
  }
  func.func @transform_4(%arg0: i32) -> (i32, i32) {
    %c0_i32 = arith.constant 0 : i32
    %c0_i32_0 = arith.constant 0 : i32
    return %arg0, %c0_i32 : i32, i32
  }
  func.func @transform_5(%arg0: i32) -> i32 {
    %c0_i32 = arith.constant 0 : i32
    %c0_i32_0 = arith.constant 0 : i32
    return %c0_i32 : i32
  }
  func.func @transform_6(%arg0: i32) -> (i32, i32) {
    %c0_i32 = arith.constant 0 : i32
    %c0_i32_0 = arith.constant 0 : i32
    return %c0_i32, %arg0 : i32, i32
  }
}

</mosaic_0001>

<bundles_post_ra>
// kernel: tpu_custom_call.1
= control target key start
LH: loop header
LB: loop body
LE: loop exit
PB: predicated region body
PF: predicated region fallthrough
CT: control target
= control target key end

     0   :  { %12 = vsyncpa [#allocation4], 0  ;;  %s599_s0 = inlined_call_operand.vmem [shape: f32[1,32], index: 0, kind: input, shape index: {}]   ;;  %s600_s1 = inlined_call_operand.hbm [shape: f32[8,32], index: 1, kind: input, shape index: {}]   ;;  %s601_s2 = inlined_call_operand.hbm [shape: f32[8,32], index: 2, kind: input, shape index: {}]   ;;  %s602_s3 = inlined_call_operand.hbm [shape: f32[8,32], index: 3, kind: input, shape index: {}]   ;;  %s603_s4 = inlined_call_operand.vmem [shape: f32[8,32], index: 4, kind: input, shape index: {}]   ;;  %s604_s5 = inlined_call_operand.<no memory space> [shape: f32[1], index: 5, kind: input, shape index: {}]   ;;  %s605_s6 = inlined_call_operand.hbm [shape: f32[4,8], index: 6, kind: output, shape index: {}]  }
   0x1   :  { %13 = vsyncpa [#allocation7], 0 }
   0x2   :  { %14 = vsyncpa [#allocation5], 0  ;;  %s525_s21 = smov [#allocation6]   ;;  %s526_s23 = smov [#allocation3]  }
   0x3   :  { %s33_s22 = sshll.u32 %s525_s21, 4  ;;  %s23_s24 = sshll.u32 %s526_s23, 4  ;;  %s34_s22 = int_to_ptr.vmem [resolvable:$true] %s33_s22  ;;  %s24_s24 = int_to_ptr.vmem [resolvable:$true] %s23_s24 }
   0x4   :  { %s447_s25 = scalar_lea.vmem %s34_s22, 128  ;;  %p452_p1 = scmp.lt.s32.totalorder %s34_s22, %s34_s22 }
   0x5   :  { %p448_p0 = scmp.ne.s32.totalorder %s34_s22, %s447_s25  ;;  %p453_p2 = scmp.lt.s32.totalorder %s447_s25, %s447_s25 }
   0x7   :  { %p454_p3 = por %p453_p2, %p452_p1 }
   0x9   :  { %p455_p4 = pnand %p454_p3, %p448_p0 }
   0xb   :  { %458 = shalt.err (!%p455_p4)
}
   0xc   :  { %36 = dma.hbm_to_vmem [thread:$0]  %s601_s2, 128, %s34_s22, [#allocation7]  }
   0xd   :  { %s467_s28 = scalar_lea.vmem %s24_s24, 128  ;;  %p472_p6 = scmp.lt.s32.totalorder %s24_s24, %s24_s24 }
   0xe   :  { %p468_p5 = scmp.ne.s32.totalorder %s24_s24, %s467_s28  ;;  %p473_p7 = scmp.lt.s32.totalorder %s467_s28, %s467_s28 }
  0x10   :  { %p474_p8 = por %p473_p7, %p472_p6 }
  0x12   :  { %p475_p9 = pnand %p474_p8, %p468_p5 }
  0x14   :  { %478 = shalt.err (!%p475_p9)
}
  0x15   :  { %26 = dma.hbm_to_vmem [thread:$0]  %s600_s1, 128, %s24_s24, [#allocation4]  }
  0x16   :  { %s527_s7 = smov [#allocation8]  }
  0x17   :  { %s43_s8 = sshll.u32 %s527_s7, 4  ;;  %s44_s8 = int_to_ptr.vmem [resolvable:$true] %s43_s8 }
  0x18   :  { %s487_s9 = scalar_lea.vmem %s44_s8, 128  ;;  %p492_p11 = scmp.lt.s32.totalorder %s44_s8, %s44_s8 }
  0x19   :  { %p488_p10 = scmp.ne.s32.totalorder %s44_s8, %s487_s9  ;;  %p493_p12 = scmp.lt.s32.totalorder %s487_s9, %s487_s9 }
  0x1b   :  { %p494_p13 = por %p493_p12, %p492_p11 }
  0x1d   :  { %p495_p0 = pnand %p494_p13, %p488_p10 }
  0x1f   :  { %498 = shalt.err (!%p495_p0)
}
  0x20   :  { %46 = dma.hbm_to_vmem [thread:$0]  %s602_s3, 128, %s44_s8, [#allocation7]  }
  0x21   :  { %519 = dma.done.wait [#allocation4], 128  }
  0x22   :  { %520 = vsyncadd [#allocation4], 4294967168 }
  0x23   :  { %521 = dma.done.wait [#allocation7], 256  }
  0x24   :  { %522 = vsyncadd [#allocation7], 4294967040  ;;  %v528_v0 = vmov 0.0   ;;  %vm529_vm0 = vmmov 0   ;;  %vm63_vm1 = vcmask 261120   ;;  %v62_v1 = vld [vmem:[#allocation6] sm:$0xff]  ;;  %v377_v16 = vstv %s604_s5 }
  0x25   :  { %413 = vmatprep.subr.mxu0 %v528_v0  ;;  %418 = vmatprep.subr.mxu1 %v528_v0  ;;  %v140_v2 = vld [vmem:[#allocation3] sm:$0xff]  ;;  %v288_v5 = vld [vmem:[#allocation8] sm:$0xff]  ;;  %vm371_vm2 = vcmask 1040384   ;;  %vm373_vm3 = vcmask 1041408   ;;  %vm375_vm4 = vcmask 1042432   ;;  %s530_s13 = smov [#allocation9]  }
  0x26   :  { %415 = vmatprep.mubr.msk.f32.mxu0 %vm529_vm0, %v528_v0  ;;  %420 = vmatprep.mubr.msk.f32.mxu1 %vm529_vm0, %v528_v0  ;;  %v60_v3 = vld [vmem:[%s599_s0] sm:$0x1]  ;;  %s387_s14 = sshll.u32 %s530_s13, 4  ;;  %vm379_vm5 = vcmask 60416   ;;  %s388_s14 = int_to_ptr.vmem [resolvable:$true] %s387_s14 }
  0x27   :  { %414 = vmatpush3.xpose.msk.msra.mxu0 %vm63_vm1, %v62_v1  ;;  %419 = vmatpush3.xpose.msk.msra.mxu1 %vm63_vm1, %v140_v2  ;;  %v214_v4 = vld [vmem:[%s603_s4] sm:$0xff]  ;;  %s499_s15 = scalar_lea.vmem %s388_s14, 64  ;;  %p504_p2 = scmp.lt.s32.totalorder %s388_s14, %s388_s14 }
  0x28   :  { %423 = vmatprep.subr.mxu0 %v528_v0  ;;  %428 = vmatprep.subr.mxu1 %v528_v0  ;;  %p500_p1 = scmp.ne.s32.totalorder %s388_s14, %s499_s15  ;;  %p505_p3 = scmp.lt.s32.totalorder %s499_s15, %s499_s15 }
  0x2a   :  { %416 = vmatmul.mubr.msk.f32.vlgmr.msra.gmra.mxu0 %vm63_vm1, %v60_v3  ;;  %421 = vmatmul.mubr.msk.f32.vlgmr.msra.gmra.mxu1 %vm63_vm1, %v60_v3  ;;  %p506_p4 = por %p505_p3, %p504_p2 }
  0x2b   :  { %424 = vmatpush3.xpose.msk.msra.mxu0 %vm63_vm1, %v214_v4  ;;  %429 = vmatpush3.xpose.msk.msra.mxu1 %vm63_vm1, %v288_v5 }
  0x2c   :  { %425 = vmatprep.mubr.msk.f32.mxu0 %vm529_vm0, %v528_v0  ;;  %430 = vmatprep.mubr.msk.f32.mxu1 %vm529_vm0, %v528_v0  ;;  %p507_p5 = pnand %p506_p4, %p500_p1 }
  0x2e   :  { %426 = vmatmul.mubr.msk.f32.vlgmr.msra.gmra.mxu0 %vm63_vm1, %v60_v3  ;;  %431 = vmatmul.mubr.msk.f32.vlgmr.msra.gmra.mxu1 %vm63_vm1, %v60_v3 }
  0xea   :  { %v136_v6 = vpop.f32.mrf.mxu0  ;;  %v210_v7 = vpop.f32.mrf.mxu1 }
  0xeb   :  { %v363_v8 = vrot.slane %v210_v7, 7 }
  0xec   :  { %v417_v9 = vpop.f32.mrf.mxu0  ;;  %v422_v10 = vpop.f32.mrf.mxu1 }
  0xed   :  { %v372_v15 = vsel %vm371_vm2, %v136_v6, %v363_v8 }
  0xee   :  { %v284_v11 = vpop.f32.mrf.mxu0  ;;  %v358_v12 = vpop.f32.mrf.mxu1 }
  0xef   :  { %v366_v13 = vrot.slane %v284_v11, 6  ;;  %v369_v14 = vrot.slane %v358_v12, 5 }
  0xf0   :  { %v427_v17 = vpop.f32.mrf.mxu0  ;;  %v432_v18 = vpop.f32.mrf.mxu1 }
  0xf1   :  { %v374_v19 = vsel %vm373_vm3, %v372_v15, %v366_v13 }
  0xf2   :  { %v376_v20 = vsel %vm375_vm4, %v374_v19, %v369_v14 }
  0xf3   :  { %v378_v21 = vadd.f32 %v377_v16, %v376_v20 }
  0xf5   :  { %380 = vst.msk [vmem:[#allocation9] sm:$0xf] %vm379_vm5, %v378_v21 }
  0xf6   :  { %510 = shalt.err (!%p507_p5)
}
  0xf7   :  { %390 = dma.vmem_to_hbm [thread:$0]  %s388_s14, 64, %s605_s6, [#allocation5]  }
  0xf8   :  { %523 = dma.done.wait [#allocation5], 64  }
  0xf9   :  { %524 = vsyncadd [#allocation5], 4294967232 }
  0xfa   :  { %394 = vsyncpa [#allocation4], 1 }
  0xfb   :  { %395 = vsyncpa [#allocation7], 1 }
  0xfc   :  { %396 = vsyncpa [#allocation5], 1 }

</bundles_post_ra>
